<compile_context>
chip_gen: v7x
topology: tpu7x:2x2x1
jax: 0.10.0
libtpu: 0.0.40
codegen_flags: <defaults>
</compile_context>

<pallas_src>
import functools

import jax
import jax.numpy as jnp
from jax.experimental import pallas as pl
from jax.experimental.pallas import tpu as pltpu

HIDDEN_PAD = 128   # padded hidden width (lanes)
HEAD_PAD = 128     # padded fused-head width (lanes) -> lane-dense stores
MAX_TB = 2048      # batch-tile cap (rows); VMEM-safe on v5e/v6e/v7x defaults


def _round_up(x, m):
    return ((x + m - 1) // m) * m


def _policy_kernel(obs_ref, rw_ref, w1o_ref, w1r_ref, b1_ref, wh_ref, bh_ref,
                   out_ref):
    # In-kernel bf16 cast of the MXU inputs (free under the DMA shadow).
    obs_bf = obs_ref[...].astype(jnp.bfloat16)
    rw_bf = rw_ref[...].astype(jnp.bfloat16)

    # Hidden layer: tanh(obs @ W1_obs + rw @ W1_rw + b1); f32 accumulation,
    # bias add (VPU) and tanh (EUP) stay in f32.
    pre = (
        jnp.dot(obs_bf, w1o_ref[...], preferred_element_type=jnp.float32)
        + jnp.dot(rw_bf, w1r_ref[...], preferred_element_type=jnp.float32)
        + b1_ref[...]
    )                                                   # (TB, HIDDEN_PAD) f32
    h = jnp.tanh(pre)

    # Fused action + value head: single MXU pass, single lane-dense bf16 store.
    out_ref[...] = (
        jnp.dot(h.astype(wh_ref.dtype), wh_ref[...],
                preferred_element_type=jnp.float32)
        + bh_ref[...]
    ).astype(out_ref.dtype)                             # (TB, HEAD_PAD) bf16


@functools.partial(jax.jit, static_argnames=("num_actions", "num_rewards"))
def multi_reward_policy_forward(obs, reward_importance, packed, *,
                                num_actions, num_rewards):
    """Fused MLP policy kernel (jitted so pad / kernel / slice fuse).

    obs:               (B, num_obs)      float32
    reward_importance: (B, num_rewards)  float32
    packed:            params from pack_params()
    returns (action_logits (B, num_actions), predicted_value (B, num_rewards)),
    both bfloat16 (the kernel writes a bf16 output slab to halve HBM writeback).
    """
    B, num_obs = obs.shape
    w1o, w1r, b1, wh, bh = (packed[k] for k in
                            ("w1_obs", "w1_rw", "b1", "w_head", "b_head"))

    # Batch tile: >= 2 grid steps when B allows (v7x: 2 TensorCores), multiple
    # of 8 sublanes, capped at MAX_TB rows.
    tb = min(MAX_TB, _round_up(max(pl.cdiv(B, 2), 1), 8))
    b_pad = _round_up(B, tb)

    obs_p, rw_p = obs, reward_importance
    if b_pad != B:
        pad = ((0, b_pad - B), (0, 0))
        obs_p = jnp.pad(obs_p, pad)
        rw_p = jnp.pad(rw_p, pad)

    fused = pl.pallas_call(
        _policy_kernel,
        grid=(b_pad // tb,),
        in_specs=[
            pl.BlockSpec((tb, num_obs), lambda i: (i, 0)),
            pl.BlockSpec((tb, num_rewards), lambda i: (i, 0)),
            pl.BlockSpec((num_obs, HIDDEN_PAD), lambda i: (0, 0)),
            pl.BlockSpec((num_rewards, HIDDEN_PAD), lambda i: (0, 0)),
            pl.BlockSpec((1, HIDDEN_PAD), lambda i: (0, 0)),
            pl.BlockSpec((HIDDEN_PAD, HEAD_PAD), lambda i: (0, 0)),
            pl.BlockSpec((1, HEAD_PAD), lambda i: (0, 0)),
        ],
        out_specs=pl.BlockSpec((tb, HEAD_PAD), lambda i: (i, 0)),
        out_shape=jax.ShapeDtypeStruct((b_pad, HEAD_PAD), jnp.bfloat16),
        compiler_params=pltpu.CompilerParams(
            dimension_semantics=("parallel",)),
    )(obs_p, rw_p, w1o, w1r, b1, wh, bh)

    # Static slices; fuse with the kernel output inside this jit.
    logits = fused[:B, :num_actions]
    value = fused[:B, num_actions:num_actions + num_rewards]
    return logits, value


def init_params(key, num_obs, num_actions, num_rewards, hidden):
    """Logical (unpadded, f32) parameters — the module's state_dict analogue."""
    d_in = num_obs + num_rewards
    k1, k2, k3, k4, k5, k6 = jax.random.split(key, 6)
    s1 = 1.0 / jnp.sqrt(jnp.float32(d_in))
    s2 = 1.0 / jnp.sqrt(jnp.float32(hidden))
    return {
        "w1": jax.random.normal(k1, (d_in, hidden), jnp.float32) * s1,
        "b1": jax.random.normal(k4, (1, hidden), jnp.float32) * 0.1,
        "w2": jax.random.normal(k2, (hidden, num_actions), jnp.float32) * s2,
        "b2": jax.random.normal(k5, (1, num_actions), jnp.float32) * 0.1,
        "wv": jax.random.normal(k3, (hidden, num_rewards), jnp.float32) * s2,
        "bv": jax.random.normal(k6, (1, num_rewards), jnp.float32) * 0.1,
    }


def pack_params(params, num_obs, num_actions, num_rewards, hidden):
    """Split W1, fuse the two heads, zero-pad to 128-lane widths, cast matmul
    weights to bf16 (biases stay f32 for f32 elementwise math)."""
    w1, b1, w2, b2, wv, bv = (params[k] for k in
                              ("w1", "b1", "w2", "b2", "wv", "bv"))
    n_head = num_actions + num_rewards
    assert hidden <= HIDDEN_PAD and n_head <= HEAD_PAD

    w1_obs = jnp.pad(w1[:num_obs], ((0, 0), (0, HIDDEN_PAD - hidden)))
    w1_rw = jnp.pad(w1[num_obs:], ((0, 0), (0, HIDDEN_PAD - hidden)))
    b1_p = jnp.pad(b1, ((0, 0), (0, HIDDEN_PAD - hidden)))
    w_head = jnp.pad(jnp.concatenate([w2, wv], axis=1),
                     ((0, HIDDEN_PAD - hidden), (0, HEAD_PAD - n_head)))
    b_head = jnp.pad(jnp.concatenate([b2, bv], axis=1),
                     ((0, 0), (0, HEAD_PAD - n_head)))
    return {
        "w1_obs": w1_obs.astype(jnp.bfloat16),
        "w1_rw": w1_rw.astype(jnp.bfloat16),
        "b1": b1_p.astype(jnp.float32),
        "w_head": w_head.astype(jnp.bfloat16),
        "b_head": b_head.astype(jnp.float32),
    }


if __name__ == "__main__":
    # Small shapes consistent with the module: num_obs, num_actions, num_rewards.
    B, NUM_OBS, NUM_ACTIONS, NUM_REWARDS, HIDDEN = 2, 16, 4, 3, 32

    key = jax.random.PRNGKey(0)
    k_obs, k_imp, k_par = jax.random.split(key, 3)
    obs = jax.random.normal(k_obs, (B, NUM_OBS), jnp.float32)
    reward_importance = jax.nn.softmax(
        jax.random.normal(k_imp, (B, NUM_REWARDS), jnp.float32), axis=-1)

    params = init_params(k_par, NUM_OBS, NUM_ACTIONS, NUM_REWARDS, HIDDEN)
    packed = pack_params(params, NUM_OBS, NUM_ACTIONS, NUM_REWARDS, HIDDEN)

    logits, value = multi_reward_policy_forward(
        obs, reward_importance, packed,
        num_actions=NUM_ACTIONS, num_rewards=NUM_REWARDS)
    jax.block_until_ready((logits, value))

    assert logits.shape == (B, NUM_ACTIONS) and value.shape == (B, NUM_REWARDS)

    # Pure-JAX f32 reference (same math as the original module).
    x = jnp.concatenate([obs, reward_importance], axis=-1)
    h_ref = jnp.tanh(x @ params["w1"] + params["b1"])
    logits_ref = h_ref @ params["w2"] + params["b2"]
    value_ref = h_ref @ params["wv"] + params["bv"]
    # bf16 MXU inputs and bf16 output slab -> bf16-level tolerance.
    assert jnp.allclose(logits.astype(jnp.float32), logits_ref,
                        atol=5e-2, rtol=5e-2), "logits mismatch"
    assert jnp.allclose(value.astype(jnp.float32), value_ref,
                        atol=5e-2, rtol=5e-2), "value mismatch"

    print("KERNEL_OK")
</pallas_src>

<mosaic_0001>
module attributes {stable_mosaic.version = 11 : i64} {
  func.func @_policy_kernel(%arg0: i32, %arg1: memref<8x16xf32, #tpu.memory_space<vmem>>, %arg2: memref<8x3xf32, #tpu.memory_space<vmem>>, %arg3: memref<16x128xbf16, #tpu.memory_space<vmem>>, %arg4: memref<3x128xbf16, #tpu.memory_space<vmem>>, %arg5: memref<1x128xf32, #tpu.memory_space<vmem>>, %arg6: memref<128x128xbf16, #tpu.memory_space<vmem>>, %arg7: memref<1x128xf32, #tpu.memory_space<vmem>>, %arg8: memref<8x128xbf16, #tpu.memory_space<vmem>>) attributes {dimension_semantics = [#tpu.dimension_semantics<parallel>], iteration_bounds = array<i64: 1>, scalar_prefetch = 0 : i64, scratch_operands = 0 : i64, tpu.core_type = #tpu.core_type<tc>, window_params = [{transform_indices = @transform_0, window_bounds = array<i64: 8, 16>}, {transform_indices = @transform_1, window_bounds = array<i64: 8, 3>}, {pipeline_mode = #tpu.pipeline_mode<synchronous>, transform_indices = @transform_2, window_bounds = array<i64: 16, 128>}, {pipeline_mode = #tpu.pipeline_mode<synchronous>, transform_indices = @transform_3, window_bounds = array<i64: 3, 128>}, {pipeline_mode = #tpu.pipeline_mode<synchronous>, transform_indices = @transform_4, window_bounds = array<i64: 1, 128>}, {pipeline_mode = #tpu.pipeline_mode<synchronous>, transform_indices = @transform_5, window_bounds = array<i64: 128, 128>}, {pipeline_mode = #tpu.pipeline_mode<synchronous>, transform_indices = @transform_6, window_bounds = array<i64: 1, 128>}, {transform_indices = @transform_7, window_bounds = array<i64: 8, 128>}]} {
    %c0 = arith.constant 0 : index
    %c0_0 = arith.constant 0 : index
    %0 = vector.load %arg1[%c0, %c0_0] : memref<8x16xf32, #tpu.memory_space<vmem>>, vector<8x16xf32>
    %1 = arith.truncf %0 : vector<8x16xf32> to vector<8x16xbf16>
    %c0_1 = arith.constant 0 : index
    %c0_2 = arith.constant 0 : index
    %2 = vector.load %arg2[%c0_1, %c0_2] : memref<8x3xf32, #tpu.memory_space<vmem>>, vector<8x3xf32>
    %3 = arith.truncf %2 : vector<8x3xf32> to vector<8x3xbf16>
    %c0_3 = arith.constant 0 : index
    %c0_4 = arith.constant 0 : index
    %4 = vector.load %arg3[%c0_3, %c0_4] : memref<16x128xbf16, #tpu.memory_space<vmem>>, vector<16x128xbf16>
    %cst = arith.constant dense<0.000000e+00> : vector<8x128xf32>
    %5 = tpu.matmul %1, %4, %cst {dimension_numbers = #tpu.dot_dimension_numbers<[1], [0], [0], [1], [0, 0, 1, 1], [], []>} : vector<8x16xbf16>, vector<16x128xbf16>, vector<8x128xf32> -> vector<8x128xf32>
    %c0_5 = arith.constant 0 : index
    %c0_6 = arith.constant 0 : index
    %6 = vector.load %arg4[%c0_5, %c0_6] : memref<3x128xbf16, #tpu.memory_space<vmem>>, vector<3x128xbf16>
    %cst_7 = arith.constant dense<0.000000e+00> : vector<8x128xf32>
    %7 = tpu.matmul %3, %6, %cst_7 {dimension_numbers = #tpu.dot_dimension_numbers<[1], [0], [0], [1], [0, 0, 1, 1], [], []>} : vector<8x3xbf16>, vector<3x128xbf16>, vector<8x128xf32> -> vector<8x128xf32>
    %8 = arith.addf %5, %7 : vector<8x128xf32>
    %c0_8 = arith.constant 0 : index
    %c0_9 = arith.constant 0 : index
    %9 = vector.load %arg5[%c0_8, %c0_9] : memref<1x128xf32, #tpu.memory_space<vmem>>, vector<1x128xf32>
    %10 = vector.broadcast %9 : vector<1x128xf32> to vector<8x128xf32>
    %11 = arith.addf %8, %10 : vector<8x128xf32>
    %12 = math.tanh %11 : vector<8x128xf32>
    %13 = arith.truncf %12 : vector<8x128xf32> to vector<8x128xbf16>
    %c0_10 = arith.constant 0 : index
    %c0_11 = arith.constant 0 : index
    %14 = vector.load %arg6[%c0_10, %c0_11] : memref<128x128xbf16, #tpu.memory_space<vmem>>, vector<128x128xbf16>
    %cst_12 = arith.constant dense<0.000000e+00> : vector<8x128xf32>
    %15 = tpu.matmul %13, %14, %cst_12 {dimension_numbers = #tpu.dot_dimension_numbers<[1], [0], [0], [1], [0, 0, 1, 1], [], []>} : vector<8x128xbf16>, vector<128x128xbf16>, vector<8x128xf32> -> vector<8x128xf32>
    %c0_13 = arith.constant 0 : index
    %c0_14 = arith.constant 0 : index
    %16 = vector.load %arg7[%c0_13, %c0_14] : memref<1x128xf32, #tpu.memory_space<vmem>>, vector<1x128xf32>
    %17 = vector.broadcast %16 : vector<1x128xf32> to vector<8x128xf32>
    %18 = arith.addf %15, %17 : vector<8x128xf32>
    %19 = arith.truncf %18 : vector<8x128xf32> to vector<8x128xbf16>
    %c0_15 = arith.constant 0 : index
    %c0_16 = arith.constant 0 : index
    %20 = vector.load %arg8[%c0_15, %c0_16] : memref<8x128xbf16, #tpu.memory_space<vmem>>, vector<8x128xbf16>
    tpu.vector_store %arg8[%c0_15, %c0_16], %19 {strides = array<i32>} : memref<8x128xbf16, #tpu.memory_space<vmem>>, vector<8x128xbf16>,
    return
  }
  func.func @transform_0(%arg0: i32) -> (i32, i32) {
    %c0_i32 = arith.constant 0 : i32
    %c0_i32_0 = arith.constant 0 : i32
    return %arg0, %c0_i32 : i32, i32
  }
  func.func @transform_1(%arg0: i32) -> (i32, i32) {
    %c0_i32 = arith.constant 0 : i32
    %c0_i32_0 = arith.constant 0 : i32
    return %arg0, %c0_i32 : i32, i32
  }
  func.func @transform_2(%arg0: i32) -> (i32, i32) {
    %c0_i32 = arith.constant 0 : i32
    %c0_i32_0 = arith.constant 0 : i32
    %c0_i32_1 = arith.constant 0 : i32
    return %c0_i32, %c0_i32_0 : i32, i32
  }
  func.func @transform_3(%arg0: i32) -> (i32, i32) {
    %c0_i32 = arith.constant 0 : i32
    %c0_i32_0 = arith.constant 0 : i32
    %c0_i32_1 = arith.constant 0 : i32
    return %c0_i32, %c0_i32_0 : i32, i32
  }
  func.func @transform_4(%arg0: i32) -> (i32, i32) {
    %c0_i32 = arith.constant 0 : i32
    %c0_i32_0 = arith.constant 0 : i32
    %c0_i32_1 = arith.constant 0 : i32
    return %c0_i32, %c0_i32_0 : i32, i32
  }
  func.func @transform_5(%arg0: i32) -> (i32, i32) {
    %c0_i32 = arith.constant 0 : i32
    %c0_i32_0 = arith.constant 0 : i32
    %c0_i32_1 = arith.constant 0 : i32
    return %c0_i32, %c0_i32_0 : i32, i32
  }
  func.func @transform_6(%arg0: i32) -> (i32, i32) {
    %c0_i32 = arith.constant 0 : i32
    %c0_i32_0 = arith.constant 0 : i32
    %c0_i32_1 = arith.constant 0 : i32
    return %c0_i32, %c0_i32_0 : i32, i32
  }
  func.func @transform_7(%arg0: i32) -> (i32, i32) {
    %c0_i32 = arith.constant 0 : i32
    %c0_i32_0 = arith.constant 0 : i32
    return %arg0, %c0_i32 : i32, i32
  }
}

</mosaic_0001>

<bundles_post_ra>
// kernel: multi_reward_policy_forward.1
= control target key start
LH: loop header
LB: loop body
LE: loop exit
PB: predicated region body
PF: predicated region fallthrough
CT: control target
= control target key end

     0   :  { %12 = vsyncpa [#allocation3], 0  ;;  %s376_s24 = smov [#allocation2]   ;;  %s458_s0 = inlined_call_operand.vmem [shape: f32[8,16], index: 0, kind: input, shape index: {}]   ;;  %s459_s1 = inlined_call_operand.vmem [shape: f32[8,3], index: 1, kind: input, shape index: {}]   ;;  %s460_s2 = inlined_call_operand.vmem [shape: bf16[16,128], index: 2, kind: input, shape index: {}]   ;;  %s461_s3 = inlined_call_operand.vmem [shape: bf16[3,128], index: 3, kind: input, shape index: {}]   ;;  %s462_s4 = inlined_call_operand.vmem [shape: f32[1,128], index: 4, kind: input, shape index: {}]   ;;  %s463_s5 = inlined_call_operand.hbm [shape: bf16[128,128], index: 5, kind: input, shape index: {}]   ;;  %s464_s6 = inlined_call_operand.vmem [shape: f32[1,128], index: 6, kind: input, shape index: {}]   ;;  %s465_s7 = inlined_call_operand.vmem [shape: bf16[8,128], index: 7, kind: output, shape index: {}]  }
   0x1   :  { %s28_s25 = sshll.u32 %s376_s24, 4  ;;  %s352_s28 = scalar_lea.hbm %s463_s5, 1024  ;;  %s29_s25 = int_to_ptr.vmem [resolvable:$true] %s28_s25 }
   0x2   :  { %p353_p0 = scmp.ne.s32.totalorder %s463_s5, %s352_s28  ;;  %p356_p1 = scmp.lt.u32.totalorder %s352_s28, %s463_s5 }
   0x4   :  { %p358_p2 = pnand %p356_p1, %p353_p0 }
   0x6   :  { %361 = shalt.err (!%p358_p2)
}
   0x7   :  { %s362_s10 = scalar_lea.vmem %s29_s25, 1024  ;;  %p367_p4 = scmp.lt.s32.totalorder %s29_s25, %s29_s25 }
   0x8   :  { %p363_p3 = scmp.ne.s32.totalorder %s29_s25, %s362_s10  ;;  %p368_p5 = scmp.lt.s32.totalorder %s362_s10, %s362_s10 }
   0xa   :  { %p369_p6 = por %p368_p5, %p367_p4 }
   0xc   :  { %p370_p7 = pnand %p369_p6, %p363_p3 }
   0xe   :  { %373 = shalt.err (!%p370_p7)
}
   0xf   :  { %s377_s11 = smov 64   ;;  %s378_s12 = smov 4  }
  0x10   :  { %34 = dma.hbm_to_vmem [thread:$0]  %s463_s5, 1024, %s29_s25, [#allocation3], %s377_s11, %s377_s11, %s378_s12  }
  0x11   :  { %374 = dma.done.wait [#allocation3], 1024  }
  0x12   :  { %375 = vsyncadd [#allocation3], 4294966272  ;;  %vm52_vm0 = vcmask 1040384   ;;  %v379_v0 = vmov 0.0   ;;  %vm53_vm1 = vcmask 1041408   ;;  %v380_v1 = vmov 65535  }
  0x13   :  { %303 = vmatprep.subr.bf16.mxu1 %v379_v0  ;;  %315 = vmatprep.subr.bf16.mxu0 %v379_v0  ;;  %v54_v2 = vsel %vm52_vm0, 4294967295, %v380_v1  ;;  %vm381_vm2 = vmmov 0   ;;  %v47_v4 = vld [vmem:[%s461_s3] sm:$0x3]  ;;  %v342_v9 = vld [vmem:[#allocation2] sm:$0xff]   ;;  %vm48_vm3 = vcmask 23552  }
  0x14   :  { %305 = vmatprep.mubr.msk.bf16.mxu1 %vm381_vm2, %v379_v0  ;;  %331 = vmatprep.mubr.msk.bf16.mxu0 %vm381_vm2, %v379_v0  ;;  %v55_v3 = vsel %vm53_vm1, %v54_v2, 0  ;;  %v43_v5 = vld [vmem:[%s459_s1] sm:$0xff]  ;;  %v343_v10 = vld [vmem:[#allocation2 + $0x8] sm:$0xff]   ;;  %vm105_vm4 = vcmask 130048   ;;  %v345_v14 = vld [vmem:[#allocation2 + $0x18] sm:$0xff]  }
  0x15   :  { %v57_v6 = vand.u32 %v55_v3, %v47_v4  ;;  %v341_v7 = vld [vmem:[%s460_s2] sm:$0xff]   ;;  %v44_v8 = vpack.c.bf16 %v43_v5, %v43_v5  ;;  %316 = vmatpush3.bf16.msra.mxu0 %v342_v9  ;;  %v346_v15 = vld [vmem:[#allocation2 + $0x20] sm:$0xff]   ;;  %v347_v16 = vld [vmem:[#allocation2 + $0x28] sm:$0xff]  }
  0x16   :  { %v41_v11 = vld [vmem:[%s458_s0] sm:$0xff]  ;;  %317 = vmatprep.subr.bf16.mxu0 %v379_v0  ;;  %v349_v18 = vld [vmem:[#allocation2 + $0x38] sm:$0xff]  }
  0x17   :  { %304 = vmatpush3.bf16.msra.mxu1 %v57_v6  ;;  %v42_v12 = vpack.c.bf16 %v41_v11, %v41_v11  ;;  %v344_v13 = vld [vmem:[#allocation2 + $0x10] sm:$0xff]  }
  0x18   :  { %309 = vmatprep.subr.bf16.mxu1 %v379_v0  ;;  %v348_v17 = vld [vmem:[#allocation2 + $0x30] sm:$0xff]  }
  0x19   :  { %318 = vmatpush3.bf16.msra.mxu0 %v343_v10  ;;  %v280_v24 = vld [vmem:[%s462_s4] ss:$0 sm:$0xff] }
  0x1a   :  { %306 = vmatmul.mubr.msk.bf16.vlgmr.msra.gmra.mrb[0].mxu1 %vm48_vm3, %v44_v8  ;;  %319 = vmatprep.subr.bf16.mxu0 %v379_v0  ;;  %v281_v32 = vld [vmem:[%s464_s6] ss:$0 sm:$0xff] }
  0x1b   :  { %310 = vmatpush3.bf16.msra.mxu1 %v341_v7  ;;  %311 = vmatprep.mubr.msk.bf16.mxu1 %vm381_vm2, %v379_v0 }
  0x1d   :  { %320 = vmatpush3.bf16.msra.mxu0 %v344_v13 }
  0x1e   :  { %321 = vmatprep.subr.bf16.mxu0 %v379_v0 }
  0x21   :  { %322 = vmatpush3.bf16.msra.mxu0 %v345_v14 }
  0x22   :  { %312 = vmatmul.mubr.msk.bf16.vlgmr.msra.gmra.mrb[4].mxu1 %vm105_vm4, %v42_v12  ;;  %323 = vmatprep.subr.bf16.mxu0 %v379_v0 }
  0x25   :  { %324 = vmatpush3.bf16.msra.mxu0 %v346_v15 }
  0x26   :  { %325 = vmatprep.subr.bf16.mxu0 %v379_v0 }
  0x29   :  { %326 = vmatpush3.bf16.msra.mxu0 %v347_v16 }
  0x2a   :  { %327 = vmatprep.subr.bf16.mxu0 %v379_v0 }
  0x2d   :  { %328 = vmatpush3.bf16.msra.mxu0 %v348_v17 }
  0x2e   :  { %329 = vmatprep.subr.bf16.mxu0 %v379_v0 }
  0x31   :  { %330 = vmatpush3.bf16.msra.mxu0 %v349_v18 }
  0xed   :  { %v93_v19 = vpop.f32.mrb[0].mxu1 }
  0xee   :  { %v307_v20 = vpop.f32.mrb[1].mxu1 }
  0xef   :  { %v96_v21 = vpop.f32.mrb[2].mxu1 }
  0xf0   :  { %v308_v22 = vpop.f32.mrb[3].mxu1 }
  0xf5   :  { %v143_v23 = vpop.f32.mrb[4].mxu1 }
  0xf6   :  { %v144_v25 = vadd.f32 %v143_v23, %v93_v19  ;;  %v313_v26 = vpop.f32.mrb[5].mxu1 }
  0xf7   :  { %v146_v27 = vpop.f32.mrb[6].mxu1 }
  0xf8   :  { %v156_v28 = vadd.f32 %v280_v24, %v144_v25  ;;  %v314_v29 = vpop.f32.mrb[7].mxu1 }
  0xfa   :  { %350 = vtanh.f32 %v156_v28 }
 0x104   :  { %v351_v30 = vpop.eup %350 }
 0x105   :  { %v158_v31 = vpack.c.bf16 %v351_v30, %v351_v30 }
 0x107   :  { %332 = vmatmul.mubr.bf16.vlgmr.msra.gmra.mrb[0].mxu0 %v158_v31 }
 0x1da   :  { %v264_v33 = vpop.f32.mrb[0].mxu0 }
 0x1db   :  { %v265_v34 = vadd.f32 %v281_v32, %v264_v33  ;;  %v333_v35 = vpop.f32.mrb[1].mxu0 }
 0x1dc   :  { %v267_v36 = vpop.f32.mrb[2].mxu0 }
 0x1dd   :  { %v270_v37 = vpack.c.bf16 %v265_v34, %v265_v34  ;;  %v334_v38 = vpop.f32.mrb[3].mxu0 }
 0x1df   :  { %271 = vst [vmem:[%s465_s7] sm:$0xf] %v270_v37 }
 0x1e0   :  { %276 = vsyncpa [#allocation3], 1 }

</bundles_post_ra>
